<compile_context>
chip_gen: v7x
topology: tpu7x:2x2x1
jax: 0.10.0
libtpu: 0.0.40
codegen_flags: <defaults>
</compile_context>

<pallas_src>
import functools

import numpy as np
import jax
import jax.numpy as jnp
from jax import lax
from jax.experimental import pallas as pl
from jax.experimental.pallas import tpu as pltpu

EPS = 1e-5


# --------------------------------------------------------------------------
# Pallas kernels
# --------------------------------------------------------------------------
def _conv_kernel(x_ref, w_ref, b_ref, *out_refs, K, TH, Wout, Cin,
                 has_bias, fuse_relu, need_stats):
    """Row-tiled KxK conv (stride 1) as ONE big-K im2col MXU matmul per
    (image, row-tile): (Cout, K*K*Cin) @ (K*K*Cin, TH*Wout).

    Writes the output directly in lane-dense flattened-NCHW layout and, when
    need_stats, emits per-tile centered BN partials (sum, M2) for a Welford/Chan
    merge in the wrapper (grid axes stay "parallel" -- no resident accumulator).
    """
    out_ref = out_refs[0]
    r = pl.program_id(1)
    row0 = pl.multiple_of(r * TH, TH)

    # Row window with halo: (Cin, TH + K - 1, Wp) -- one dynamic-sublane load;
    # taps are static slices of this window (bounded VMEM working set).
    win = x_ref[0, :, pl.ds(row0, TH + K - 1), :]
    taps = [win[:, ky:ky + TH, kx:kx + Wout]
            for ky in range(K) for kx in range(K)]
    patch = taps[0] if len(taps) == 1 else jnp.concatenate(taps, axis=0)
    patch = patch.reshape(K * K * Cin, TH * Wout)

    acc = lax.dot_general(w_ref[...], patch, (((1,), (0,)), ((), ())),
                          preferred_element_type=jnp.float32)    # (Cout, TH*Wout) f32
    if has_bias:                                                 # static gate, no zero-add
        acc = acc + b_ref[...]                                   # (Cout, 1) broadcast
    if fuse_relu:                                                # no-BN fused epilogue
        acc = jnp.maximum(acc, 0.0)

    y = acc.astype(out_ref.dtype)
    out_ref[0] = y

    if need_stats:
        # Stats on the *stored* (possibly bf16-rounded) value -> pass 2 normalizes
        # exactly what these statistics describe. Centered per-tile (Welford partial).
        z = y.astype(jnp.float32)
        s = jnp.sum(z, axis=1, keepdims=True)                    # (Cout, 1)
        mu = s * (1.0 / (TH * Wout))
        m2 = jnp.sum((z - mu) * (z - mu), axis=1, keepdims=True)
        out_refs[1][0, 0] = s
        out_refs[2][0, 0] = m2


def _scale_shift_relu_kernel(z_ref, scale_ref, shift_ref, out_ref, *, relu):
    """Fused BN affine (precomputed per-channel scale/shift) + optional ReLU on
    lane-dense (Cout, pixel-tile) blocks already in the final NCHW-flat layout."""
    z = z_ref[0].astype(jnp.float32)                             # (Cout, TP)
    y = z * scale_ref[...] + shift_ref[...]
    if relu:
        y = jnp.maximum(y, 0.0)
    out_ref[0] = y.astype(out_ref.dtype)


# --------------------------------------------------------------------------
# Tile pickers
# --------------------------------------------------------------------------
def _pick_row_tile(Hout, Wout, contract, Cout, compute_bytes,
                   budget=6 << 20, force=None):
    """Largest divisor TH of Hout whose per-step im2col working set fits `budget`
    and whose output-tile lane extent (TH*Wout) is 128-aligned (or the full image)."""
    if force is not None:
        assert Hout % force == 0
        assert force == Hout or (force * Wout) % 128 == 0
        return force
    for th in range(Hout, 0, -1):
        if Hout % th:
            continue
        if th != Hout and (th * Wout) % 128 != 0:
            continue
        work = contract * th * Wout * compute_bytes + Cout * th * Wout * 4
        if work <= budget:
            return th
    # TODO(synk): pad Wout to a multiple of 128 so row tiles are always admissible /
    # lane-aligned; until then fall back to whole-image tiles.
    return Hout


def _pick_pixel_tile(P):
    """Fixed lane-dense pixel tile for the BN+ReLU pass, used with a cdiv grid
    (ragged tail handled by Pallas). Small P falls back to the full extent."""
    if P <= 256:
        return P
    return min(2048, (P // 128) * 128)


# --------------------------------------------------------------------------
# Wrapper
# --------------------------------------------------------------------------
def conv_bn_relu_forward(x, params, *, pad=None, has_bn=True, has_relu=True,
                         running_stats=None, compute_dtype=jnp.bfloat16,
                         eps=EPS, row_tile=None):
    """ConvBnRelu forward: Conv2d(ksize, stride=1, padding=pad, bias optional)
    -> BatchNorm2d -> ReLU.  x is NCHW.

    BatchNorm uses batch statistics (PyTorch training-mode forward) unless
    `running_stats=(mean, var)` is given, in which case BN is folded into the
    conv weights/bias and the whole module runs as a single fused pass."""
    w, b, gamma, beta = params
    Cout, Cin, K, _ = w.shape
    N, Cx, H, W = x.shape
    assert Cx == Cin
    ph = K // 2 if pad is None else pad
    Hout, Wout = H + 2 * ph - K + 1, W + 2 * ph - K + 1
    P = Hout * Wout
    f32 = jnp.float32

    # TODO(synk): stride>1 / dilation>1 / groups>1 of nn.Conv2d not implemented.

    # Eval-mode BN (running statistics): fold scale/shift into weights/bias so the
    # whole module is one fused pallas_call (no batch statistics, no second pass).
    fold_bn = has_bn and running_stats is not None
    if fold_bn:
        rm, rv = running_stats
        s = gamma.astype(f32) / jnp.sqrt(rv.astype(f32) + eps)
        w = w * s[:, None, None, None]
        b0 = jnp.zeros((Cout,), f32) if b is None else b.astype(f32)
        b = b0 * s + beta.astype(f32) - rm.astype(f32) * s
    batch_bn = has_bn and not fold_bn
    has_bias = b is not None

    # TODO(synk): fold the halo into the kernel (VMEM zero-fill / guarded loads) to
    # drop this extra HBM pass over the input.
    xpad = x if ph == 0 else jnp.pad(x, ((0, 0), (0, 0), (ph, ph), (ph, ph)))
    xpad = xpad.astype(compute_dtype)
    Hp, Wp = H + 2 * ph, W + 2 * ph

    # (Cout, Cin, K, K) -> (Cout, K*K*Cin), tap-major / channel-minor (im2col order).
    CKK = K * K * Cin
    w_flat = jnp.transpose(w, (0, 2, 3, 1)).reshape(Cout, CKK).astype(compute_dtype)
    bias_col = (jnp.zeros((Cout, 1), f32) if b is None
                else b.reshape(Cout, 1).astype(f32))

    cbytes = jnp.dtype(compute_dtype).itemsize
    TH = _pick_row_tile(Hout, Wout, CKK, Cout, cbytes, force=row_tile)
    R = Hout // TH
    TPix = TH * Wout

    need_stats = batch_bn
    fused = not batch_bn                       # no second pass needed
    conv_out_dtype = x.dtype if fused else compute_dtype
    fuse_relu = fused and has_relu

    if need_stats:
        stat_spec = pl.BlockSpec((1, 1, Cout, 1), lambda n, r: (n, r, 0, 0))
        out_specs = [pl.BlockSpec((1, Cout, TPix), lambda n, r: (n, 0, r)),
                     stat_spec, stat_spec]
        out_shape = [jax.ShapeDtypeStruct((N, Cout, P), conv_out_dtype),
                     jax.ShapeDtypeStruct((N, R, Cout, 1), f32),
                     jax.ShapeDtypeStruct((N, R, Cout, 1), f32)]
    else:
        out_specs = pl.BlockSpec((1, Cout, TPix), lambda n, r: (n, 0, r))
        out_shape = jax.ShapeDtypeStruct((N, Cout, P), conv_out_dtype)

    conv_results = pl.pallas_call(
        functools.partial(_conv_kernel, K=K, TH=TH, Wout=Wout, Cin=Cin,
                          has_bias=has_bias, fuse_relu=fuse_relu,
                          need_stats=need_stats),
        grid=(N, R),
        in_specs=[
            pl.BlockSpec((1, Cin, Hp, Wp), lambda n, r: (n, 0, 0, 0)),
            pl.BlockSpec((Cout, CKK), lambda n, r: (0, 0)),
            pl.BlockSpec((Cout, 1), lambda n, r: (0, 0)),
        ],
        out_specs=out_specs,
        out_shape=out_shape,
        compiler_params=pltpu.CompilerParams(
            dimension_semantics=("parallel", "parallel")),
    )(xpad, w_flat, bias_col)

    if fused:
        # Metadata-only reshape back to NCHW -- no transpose pass, no second kernel.
        return conv_results.reshape(N, Cout, Hout, Wout)

    conv_out, psum, pm2 = conv_results

    # ---- per-channel scale/shift from batch statistics (Welford/Chan merge) ----
    cnt_b = float(TPix)
    cnt = float(N * P)
    mean = jnp.sum(psum, axis=(0, 1)) / cnt                         # (Cout, 1)
    mu_b = psum / cnt_b                                             # (N, R, Cout, 1)
    m2 = jnp.sum(pm2, axis=(0, 1)) + cnt_b * jnp.sum((mu_b - mean) ** 2, axis=(0, 1))
    var = m2 / cnt                                                  # biased (training BN)
    scale = gamma.reshape(Cout, 1).astype(f32) * lax.rsqrt(var + eps)
    shift = beta.reshape(Cout, 1).astype(f32) - mean * scale

    # ---- fused BN affine + ReLU, tiled over (batch, pixel chunks), cdiv grid ----
    TP = _pick_pixel_tile(P)
    out_flat = pl.pallas_call(
        functools.partial(_scale_shift_relu_kernel, relu=has_relu),
        grid=(N, pl.cdiv(P, TP)),
        in_specs=[
            pl.BlockSpec((1, Cout, TP), lambda n, p: (n, 0, p)),
            pl.BlockSpec((Cout, 1), lambda n, p: (0, 0)),
            pl.BlockSpec((Cout, 1), lambda n, p: (0, 0)),
        ],
        out_specs=pl.BlockSpec((1, Cout, TP), lambda n, p: (n, 0, p)),
        out_shape=jax.ShapeDtypeStruct((N, Cout, P), x.dtype),
        compiler_params=pltpu.CompilerParams(
            dimension_semantics=("parallel", "parallel")),
    )(conv_out, scale, shift)

    return out_flat.reshape(N, Cout, Hout, Wout)


# --------------------------------------------------------------------------
# Init + pure-JAX reference
# --------------------------------------------------------------------------
def init_params(key, in_planes, out_planes, *, ksize=3, has_bias=False):
    k1, k2, k3, k4 = jax.random.split(key, 4)
    fan_in = in_planes * ksize * ksize
    bound = 1.0 / float(np.sqrt(fan_in))     # nn.Conv2d default kaiming_uniform(a=sqrt(5))
    w = jax.random.uniform(k1, (out_planes, in_planes, ksize, ksize),
                           jnp.float32, -bound, bound)
    b = (jax.random.uniform(k2, (out_planes,), jnp.float32, -bound, bound)
         if has_bias else None)
    gamma = 1.0 + 0.1 * jax.random.normal(k3, (out_planes,), jnp.float32)
    beta = 0.1 * jax.random.normal(k4, (out_planes,), jnp.float32)
    return w, b, gamma, beta


def reference_forward(x, params, *, pad=None, has_bn=True, has_relu=True,
                      running_stats=None, eps=EPS):
    w, b, gamma, beta = params
    K = w.shape[2]
    ph = K // 2 if pad is None else pad
    z = lax.conv_general_dilated(x, w, (1, 1), ((ph, ph), (ph, ph)),
                                 dimension_numbers=('NCHW', 'OIHW', 'NCHW'),
                                 precision=lax.Precision.HIGHEST)
    if b is not None:
        z = z + b[None, :, None, None]
    if has_bn:
        if running_stats is not None:
            mean = running_stats[0][None, :, None, None]
            var = running_stats[1][None, :, None, None]
        else:
            mean = z.mean(axis=(0, 2, 3), keepdims=True)
            var = z.var(axis=(0, 2, 3), keepdims=True)           # biased (training BN)
        z = ((z - mean) / jnp.sqrt(var + eps) * gamma[None, :, None, None]
             + beta[None, :, None, None])
    if has_relu:
        z = jnp.maximum(z, 0.0)
    return z


if __name__ == "__main__":
    key = jax.random.PRNGKey(0)
    kx, kx2, kp3, kp1, km, kv = jax.random.split(key, 6)

    N, Cin, Cout, H, W = 2, 4, 8, 16, 16
    x = jax.random.normal(kx, (N, Cin, H, W), jnp.float32)

    params3 = init_params(kp3, Cin, Cout, ksize=3, has_bias=False)
    params1 = init_params(kp1, Cin, Cout, ksize=1, has_bias=True)

    # 1) Default path: 3x3, BN + ReLU, bf16 compute / bf16 intermediate (f32 acc/stats).
    ref = jax.block_until_ready(reference_forward(x, params3))
    out = jax.block_until_ready(conv_bn_relu_forward(x, params3))
    assert out.shape == (N, Cout, H, W)
    np.testing.assert_allclose(np.asarray(out), np.asarray(ref), rtol=5e-2, atol=5e-2)

    # 2) f32 compute, forced row tiling (TH=8 -> 2 row tiles per image).
    out32 = jax.block_until_ready(
        conv_bn_relu_forward(x, params3, compute_dtype=jnp.float32, row_tile=8))
    np.testing.assert_allclose(np.asarray(out32), np.asarray(ref), rtol=5e-3, atol=5e-3)

    # 3) 1x1, pad 0, with bias, BN + ReLU, f32.
    ref1 = jax.block_until_ready(reference_forward(x, params1))
    out1 = jax.block_until_ready(
        conv_bn_relu_forward(x, params1, compute_dtype=jnp.float32))
    np.testing.assert_allclose(np.asarray(out1), np.asarray(ref1), rtol=5e-3, atol=5e-3)

    # 4) has_bn=False: single fused pass (conv + ReLU in the epilogue, no 2nd kernel).
    refc = jax.block_until_ready(reference_forward(x, params3, has_bn=False))
    outc = jax.block_until_ready(
        conv_bn_relu_forward(x, params3, has_bn=False, compute_dtype=jnp.float32))
    np.testing.assert_allclose(np.asarray(outc), np.asarray(refc), rtol=5e-3, atol=5e-3)

    # 5) Eval-mode BN (running stats): folded into weights -> single fused pass.
    rmean = 0.1 * jax.random.normal(km, (Cout,), jnp.float32)
    rvar = jax.random.uniform(kv, (Cout,), jnp.float32, 0.5, 1.5)
    refe = jax.block_until_ready(
        reference_forward(x, params3, running_stats=(rmean, rvar)))
    oute = jax.block_until_ready(
        conv_bn_relu_forward(x, params3, running_stats=(rmean, rvar),
                             compute_dtype=jnp.float32))
    np.testing.assert_allclose(np.asarray(oute), np.asarray(refe), rtol=5e-3, atol=5e-3)

    # 6) Non-128-aligned spatial size (P=400): exercises the cdiv/ragged BN pixel tile.
    x2 = jax.random.normal(kx2, (N, Cin, 20, 20), jnp.float32)
    ref2 = jax.block_until_ready(reference_forward(x2, params3))
    out2 = jax.block_until_ready(
        conv_bn_relu_forward(x2, params3, compute_dtype=jnp.float32))
    np.testing.assert_allclose(np.asarray(out2), np.asarray(ref2), rtol=5e-3, atol=5e-3)

    print("KERNEL_OK")
</pallas_src>

<mosaic_0001>
module attributes {stable_mosaic.version = 11 : i64} {
  func.func @_conv_kernel(%arg0: i32, %arg1: i32, %arg2: memref<1x4x18x18xbf16, #tpu.memory_space<vmem>>, %arg3: memref<8x36xbf16, #tpu.memory_space<vmem>>, %arg4: memref<8x1xf32, #tpu.memory_space<vmem>>, %arg5: memref<1x8x256xbf16, #tpu.memory_space<vmem>>, %arg6: memref<1x1x8x1xf32, #tpu.memory_space<vmem>>, %arg7: memref<1x1x8x1xf32, #tpu.memory_space<vmem>>) attributes {dimension_semantics = [#tpu.dimension_semantics<parallel>, #tpu.dimension_semantics<parallel>], iteration_bounds = array<i64: 2, 1>, scalar_prefetch = 0 : i64, scratch_operands = 0 : i64, tpu.core_type = #tpu.core_type<tc>, window_params = [{transform_indices = @transform_0, window_bounds = array<i64: 1, 4, 18, 18>}, {pipeline_mode = #tpu.pipeline_mode<synchronous>, transform_indices = @transform_1, window_bounds = array<i64: 8, 36>}, {pipeline_mode = #tpu.pipeline_mode<synchronous>, transform_indices = @transform_2, window_bounds = array<i64: 8, 1>}, {transform_indices = @transform_3, window_bounds = array<i64: 1, 8, 256>}, {transform_indices = @transform_4, window_bounds = array<i64: 1, 1, 8, 1>}, {transform_indices = @transform_5, window_bounds = array<i64: 1, 1, 8, 1>}]} {
    %c16_i32 = arith.constant 16 : i32
    %0 = arith.muli %arg1, %c16_i32 : i32
    %1 = tpu.assume_multiple %0, 16 : i32
    %c0 = arith.constant 0 : index
    %c0_0 = arith.constant 0 : index
    %2 = arith.index_cast %1 : i32 to index
    %c0_1 = arith.constant 0 : index
    %3 = vector.load %arg2[%c0, %c0_0, %2, %c0_1] : memref<1x4x18x18xbf16, #tpu.memory_space<vmem>>, vector<1x4x18x18xbf16>
    %4 = vector.shape_cast %3 : vector<1x4x18x18xbf16> to vector<4x18x18xbf16>
    %5 = vector.extract_strided_slice %4 {offsets = [0, 0, 0], sizes = [4, 16, 16], strides = [1, 1, 1]} : vector<4x18x18xbf16> to vector<4x16x16xbf16>
    %6 = vector.extract_strided_slice %4 {offsets = [0, 0, 1], sizes = [4, 16, 16], strides = [1, 1, 1]} : vector<4x18x18xbf16> to vector<4x16x16xbf16>
    %7 = vector.extract_strided_slice %4 {offsets = [0, 0, 2], sizes = [4, 16, 16], strides = [1, 1, 1]} : vector<4x18x18xbf16> to vector<4x16x16xbf16>
    %8 = vector.extract_strided_slice %4 {offsets = [0, 1, 0], sizes = [4, 16, 16], strides = [1, 1, 1]} : vector<4x18x18xbf16> to vector<4x16x16xbf16>
    %9 = vector.extract_strided_slice %4 {offsets = [0, 1, 1], sizes = [4, 16, 16], strides = [1, 1, 1]} : vector<4x18x18xbf16> to vector<4x16x16xbf16>
    %10 = vector.extract_strided_slice %4 {offsets = [0, 1, 2], sizes = [4, 16, 16], strides = [1, 1, 1]} : vector<4x18x18xbf16> to vector<4x16x16xbf16>
    %11 = vector.extract_strided_slice %4 {offsets = [0, 2, 0], sizes = [4, 16, 16], strides = [1, 1, 1]} : vector<4x18x18xbf16> to vector<4x16x16xbf16>
    %12 = vector.extract_strided_slice %4 {offsets = [0, 2, 1], sizes = [4, 16, 16], strides = [1, 1, 1]} : vector<4x18x18xbf16> to vector<4x16x16xbf16>
    %13 = vector.extract_strided_slice %4 {offsets = [0, 2, 2], sizes = [4, 16, 16], strides = [1, 1, 1]} : vector<4x18x18xbf16> to vector<4x16x16xbf16>
    %14 = tpu.concatenate %5, %6, %7, %8, %9, %10, %11, %12, %13 in 0 : vector<4x16x16xbf16>, vector<4x16x16xbf16>, vector<4x16x16xbf16>, vector<4x16x16xbf16>, vector<4x16x16xbf16>, vector<4x16x16xbf16>, vector<4x16x16xbf16>, vector<4x16x16xbf16>, vector<4x16x16xbf16> -> vector<36x16x16xbf16>
    %15 = vector.shape_cast %14 : vector<36x16x16xbf16> to vector<36x256xbf16>
    %c0_2 = arith.constant 0 : index
    %c0_3 = arith.constant 0 : index
    %16 = vector.load %arg3[%c0_2, %c0_3] : memref<8x36xbf16, #tpu.memory_space<vmem>>, vector<8x36xbf16>
    %cst = arith.constant dense<0.000000e+00> : vector<8x256xf32>
    %17 = tpu.matmul %16, %15, %cst {dimension_numbers = #tpu.dot_dimension_numbers<[1], [0], [0], [1], [0, 0, 1, 1], [], []>} : vector<8x36xbf16>, vector<36x256xbf16>, vector<8x256xf32> -> vector<8x256xf32>
    %18 = arith.truncf %17 : vector<8x256xf32> to vector<8x256xbf16>
    %c0_4 = arith.constant 0 : index
    %c0_5 = arith.constant 0 : index
    %c0_6 = arith.constant 0 : index
    %19 = vector.load %arg5[%c0_4, %c0_5, %c0_6] : memref<1x8x256xbf16, #tpu.memory_space<vmem>>, vector<1x8x256xbf16>
    %20 = vector.shape_cast %19 : vector<1x8x256xbf16> to vector<8x256xbf16>
    %21 = vector.shape_cast %18 : vector<8x256xbf16> to vector<1x8x256xbf16>
    tpu.vector_store %arg5[%c0_4, %c0_5, %c0_6], %21 {strides = array<i32>} : memref<1x8x256xbf16, #tpu.memory_space<vmem>>, vector<1x8x256xbf16>,
    %22 = arith.extf %18 : vector<8x256xbf16> to vector<8x256xf32>
    %cst_7 = arith.constant dense<0.000000e+00> : vector<8xf32>
    %23 = vector.multi_reduction <add>, %22, %cst_7 [1] : vector<8x256xf32> to vector<8xf32>
    %24 = vector.shape_cast %23 : vector<8xf32> to vector<8x1xf32>
    %cst_8 = arith.constant 3.906250e-03 : f32
    %25 = vector.broadcast %cst_8 : f32 to vector<8x1xf32>
    %26 = arith.mulf %24, %25 : vector<8x1xf32>
    %27 = vector.broadcast %26 : vector<8x1xf32> to vector<8x256xf32>
    %28 = arith.subf %22, %27 : vector<8x256xf32>
    %29 = vector.broadcast %26 : vector<8x1xf32> to vector<8x256xf32>
    %30 = arith.subf %22, %29 : vector<8x256xf32>
    %31 = arith.mulf %28, %30 : vector<8x256xf32>
    %cst_9 = arith.constant dense<0.000000e+00> : vector<8xf32>
    %32 = vector.multi_reduction <add>, %31, %cst_9 [1] : vector<8x256xf32> to vector<8xf32>
    %33 = vector.shape_cast %32 : vector<8xf32> to vector<8x1xf32>
    %c0_10 = arith.constant 0 : index
    %c0_11 = arith.constant 0 : index
    %c0_12 = arith.constant 0 : index
    %c0_13 = arith.constant 0 : index
    %34 = vector.load %arg6[%c0_10, %c0_11, %c0_12, %c0_13] : memref<1x1x8x1xf32, #tpu.memory_space<vmem>>, vector<1x1x8x1xf32>
    %35 = vector.shape_cast %34 : vector<1x1x8x1xf32> to vector<8x1xf32>
    %36 = vector.shape_cast %24 : vector<8x1xf32> to vector<1x1x8x1xf32>
    tpu.vector_store %arg6[%c0_10, %c0_11, %c0_12, %c0_13], %36 {strides = array<i32>} : memref<1x1x8x1xf32, #tpu.memory_space<vmem>>, vector<1x1x8x1xf32>,
    %c0_14 = arith.constant 0 : index
    %c0_15 = arith.constant 0 : index
    %c0_16 = arith.constant 0 : index
    %c0_17 = arith.constant 0 : index
    %37 = vector.load %arg7[%c0_14, %c0_15, %c0_16, %c0_17] : memref<1x1x8x1xf32, #tpu.memory_space<vmem>>, vector<1x1x8x1xf32>
    %38 = vector.shape_cast %37 : vector<1x1x8x1xf32> to vector<8x1xf32>
    %39 = vector.shape_cast %33 : vector<8x1xf32> to vector<1x1x8x1xf32>
    tpu.vector_store %arg7[%c0_14, %c0_15, %c0_16, %c0_17], %39 {strides = array<i32>} : memref<1x1x8x1xf32, #tpu.memory_space<vmem>>, vector<1x1x8x1xf32>,
    return
  }
  func.func @transform_0(%arg0: i32, %arg1: i32) -> (i32, i32, i32, i32) {
    %c0_i32 = arith.constant 0 : i32
    %c0_i32_0 = arith.constant 0 : i32
    %c0_i32_1 = arith.constant 0 : i32
    %c0_i32_2 = arith.constant 0 : i32
    return %arg0, %c0_i32, %c0_i32_0, %c0_i32_1 : i32, i32, i32, i32
  }
  func.func @transform_1(%arg0: i32, %arg1: i32) -> (i32, i32) {
    %c0_i32 = arith.constant 0 : i32
    %c0_i32_0 = arith.constant 0 : i32
    %c0_i32_1 = arith.constant 0 : i32
    return %c0_i32, %c0_i32_0 : i32, i32
  }
  func.func @transform_2(%arg0: i32, %arg1: i32) -> (i32, i32) {
    %c0_i32 = arith.constant 0 : i32
    %c0_i32_0 = arith.constant 0 : i32
    %c0_i32_1 = arith.constant 0 : i32
    return %c0_i32, %c0_i32_0 : i32, i32
  }
  func.func @transform_3(%arg0: i32, %arg1: i32) -> (i32, i32, i32) {
    %c0_i32 = arith.constant 0 : i32
    %c0_i32_0 = arith.constant 0 : i32
    return %arg0, %c0_i32, %arg1 : i32, i32, i32
  }
  func.func @transform_4(%arg0: i32, %arg1: i32) -> (i32, i32, i32, i32) {
    %c0_i32 = arith.constant 0 : i32
    %c0_i32_0 = arith.constant 0 : i32
    %c0_i32_1 = arith.constant 0 : i32
    return %arg0, %arg1, %c0_i32, %c0_i32_0 : i32, i32, i32, i32
  }
  func.func @transform_5(%arg0: i32, %arg1: i32) -> (i32, i32, i32, i32) {
    %c0_i32 = arith.constant 0 : i32
    %c0_i32_0 = arith.constant 0 : i32
    %c0_i32_1 = arith.constant 0 : i32
    return %arg0, %arg1, %c0_i32, %c0_i32_0 : i32, i32, i32, i32
  }
}

</mosaic_0001>

<bundles_post_ra>
// kernel: tpu_custom_call.1
= control target key start
LH: loop header
LB: loop body
LE: loop exit
PB: predicated region body
PF: predicated region fallthrough
CT: control target
= control target key end

     0   :  { %11 = vsyncpa [#allocation3], 0  ;;  %s3355_s0 = inlined_call_operand.vmem [shape: bf16[2,4,18,18], index: 0, kind: input, shape index: {}]   ;;  %s3356_s1 = inlined_call_operand.vmem [shape: bf16[8,36], index: 1, kind: input, shape index: {}]   ;;  %s3357_s2 = inlined_call_operand.vmem [shape: f32[8,1], index: 2, kind: input, shape index: {}]   ;;  %s3358_s3 = inlined_call_operand.hbm [shape: bf16[2,8,256], index: 3, kind: output, shape index: {0}]   ;;  %s3359_s4 = inlined_call_operand.vmem [shape: f32[2,1,8,1], index: 4, kind: output, shape index: {1}]   ;;  %s3360_s5 = inlined_call_operand.vmem [shape: f32[2,1,8,1], index: 5, kind: output, shape index: {2}]  }
   0x1   :  { %13 = vsyncpa [#allocation3 + $0x1], 0  ;;  %s2401_s18 = smov 0   ;;  %s2403_s19 = smov 0  }
   0x2   :  { %s2405_s20 = smov 0   ;;  %s2407_s21 = smov 0  }
   0x3   :  { %s2409_s2 = smov 0   ;;  %s2411_s22 = smov 0  }
   0x4 LB: > { %s2115_s23 = sadd.s32 4294967295, %s2356_s22   ;;  %s2116_s24 = sadd.s32 4294967294, %s2356_s22   ;;  %s2356_s22 = sphi %s2411_s22, %s19_s22   ;;  %s2352_s2 = sphi %s2409_s2, %s3388_s2   ;;  %s2348_s21 = sphi %s2407_s21, %s3387_s21   ;;  %s2344_s20 = sphi %s2405_s20, %s3386_s20   ;;  %s2340_s19 = sphi %s2403_s19, %s3385_s19   ;;  %s2336_s18 = sphi %s2401_s18, %s3384_s18  }
   0x5   : > { %s31_s25 = sadd.s32 1, %s2352_s2  ;;  %s108_s26 = sadd.s32 1, %s2344_s20 }
   0x6   : > { %p33_p0 = scmp.ge.s32.totalorder %s31_s25, 2  ;;  %p118_p1 = scmp.ne.s32.totalorder %s2344_s20, %s2340_s19 }
   0x7   : > { %p119_p2 = scmp.eq.s32.totalorder %s2115_s23, 1  ;;  %p124_p3 = scmp.ne.s32.totalorder %s2340_s19, %s2336_s18 }
   0x8   : > { %s3390_s25 = smov (%p33_p0, %s31_s25), 0  ;;  %p125_p5 = scmp.eq.s32.totalorder %s2116_s24, 1 }
   0x9   : > { %p2441_p4 = por %p119_p2, %p118_p1  ;;  %s103_s28 = ssub.s32 %s2352_s2, %s3390_s25 }
   0xa   : > { %p2119_p6 = scmp.ge.s32.totalorder %s2356_s22, 1  ;;  %p106_p7 = scmp.eq.s32.totalorder %s103_s28, 0 }
   0xb   : > { %p2448_p8 = por %p125_p5, %p124_p3  ;;  %p213_p9 = scmp.lt.s32.totalorder %s2356_s22, 3 }
   0xc   : > { %s2454_s30 = scalar_select %p106_p7, %s2344_s20, %s108_s26  }
   0xd   : > { %p214_p10 = pnand %p2119_p6, %p213_p9 }
   0xf   : > { %217 = sbr.rel (%p214_p10) target bundleno = 925 (0x39d), region = 32 }
  0x16   : > { %p255_p11 = scmp.lt.s32.totalorder %s2348_s21, 1  ;;  %s2358_s11 = smov 127   ;;  %vm333_vm0 = vsmask.f32 3328  ;;  %vm334_vm1 = vsmask.f32 7440 }
  0x17   : > { %s2359_s12 = smov 126   ;;  %vm2570_vm2 = vmor %vm333_vm0, %vm334_vm1  ;;  %vm468_vm3 = vcmask 1042432   ;;  %vm469_vm4 = vcmask 1046532   ;;  %s2362_s13 = smov 32   ;;  %vm1767_vm6 = vcmask 130048   ;;  %vm1777_vm7 = vcmask 261120  }
  0x18   : > { %s2458_s6 = scalar_select %p255_p11, %s2348_s21, 1  ;;  %vm2687_vm5 = vmor %vm468_vm3, %vm469_vm4  ;;  %vm1784_vm8 = vcmask 392192   ;;  %vm1791_vm9 = vcmask 523264   ;;  %vm1798_vm10 = vcmask 654336   ;;  %vm1805_vm11 = vcmask 785408  }
  0x19   : > { %s2363_s14 = smov 64   ;;  %s2364_s15 = smov 16   ;;  %vm1812_vm12 = vcmask 916480   ;;  %vm1873_vm13 = vcmask 1041408   ;;  %vm1869_vm14 = vcmask 293888   ;;  %vm1941_vm15 = vcmask 7168  }
  0x1a   : > { %s2210_s7 = smul.u32 48, %s2458_s6  ;;  %s2365_s16 = smov 48  }
  0x1b   : > { %s2366_s17 = smov 96   ;;  %s2367_s23 = smov 80  }
  0x1c   : > { %s2464_s10 = scalar_lea.vmem %s3355_s0, %s2210_s7  ;;  %s2368_s24 = smov 112  }
  0x1d   : > { %v2467_v0 = vld [vmem:[%s2464_s10 + $0x1c] sm:$0xf]  ;;  %v2470_v1 = vld [vmem:[%s2464_s10 + $0x4] sm:$0xf]  ;;  %v2473_v2 = vld [vmem:[%s2464_s10 + $0x28] sm:$0xf] }
  0x1e   : > { %311 = vrot.lane.b32.xlu1 %v2467_v0, %s2358_s11  ;;  %303 = vrot.lane.b32.xlu0 %v2470_v1, %s2358_s11  ;;  %v2480_v3 = vld [vmem:[%s2464_s10 + $0x10] sm:$0xf]  ;;  %v667_v4 = vpack.i.b16 %v2473_v2, %v2467_v0  ;;  %v346_v6 = vshll.u32 %v2470_v1, 16  ;;  %v350_v7 = vshrl.u32 %v2470_v1, 16  ;;  %v2495_v10 = vld [vmem:[%s2464_s10 + $0x14] sm:$0x1] }
  0x1f   : > { %v663_v5 = vpack.i.b16 %v2480_v3, %v2470_v1  ;;  %v370_v8 = vshll.u32 %v2480_v3, 16  ;;  %v374_v9 = vshrl.u32 %v2480_v3, 16  ;;  %v418_v11 = vshll.u32 %v2473_v2, 16  ;;  %v2504_v13 = vld [vmem:[%s2464_s10 + $0x8] sm:$0x1]  ;;  %s234_s7 = sand.u32 1, %s2340_s19  }
  0x20   : > { %v422_v12 = vshrl.u32 %v2473_v2, 16  ;;  %v2506_v14 = vrot.slane %v346_v6, 5  ;;  %v352_v15 = vrot.slane %v350_v7, 4  ;;  %v394_v16 = vshll.u32 %v2467_v0, 16  ;;  %v2517_v20 = vld [vmem:[%s2464_s10 + $0x2c] sm:$0x1] }
  0x21   : > { %v398_v17 = vshrl.u32 %v2467_v0, 16  ;;  %v2512_v18 = vrot.slane %v370_v8, 5  ;;  %v376_v19 = vrot.slane %v374_v9, 4  ;;  %v2520_v21 = vld [vmem:[%s2464_s10 + $0x20] sm:$0x1]  ;;  %v380_v22 = vshll.u32 %v2495_v10, 16 }
  0x22   : > { %315 = vrot.lane.b32.xlu1 %v2473_v2, %s2358_s11  ;;  %307 = vrot.lane.b32.xlu0 %v2480_v3, %s2358_s11  ;;  %v356_v23 = vshll.u32 %v2504_v13, 16  ;;  %v2524_v24 = vrot.slane %v418_v11, 5  ;;  %v424_v25 = vrot.slane %v422_v12, 4  ;;  %v353_v26 = vor.u32 %v352_v15, %v2506_v14  ;;  %v2539_v30 = vld [vmem:[%s2464_s10 + $0xc] sm:$0xf]  ;;  %s2120_s8 = sshll.u32 %s234_s7, 3 }
  0x23   : > { %v428_v27 = vshll.u32 %v2517_v20, 16  ;;  %v2534_v28 = vrot.slane %v394_v16, 5  ;;  %v400_v29 = vrot.slane %v398_v17, 4  ;;  %v2542_v31 = vld [vmem:[%s2464_s10] sm:$0xf]  ;;  %v377_v32 = vor.u32 %v376_v19, %v2512_v18  ;;  %s236_s9 = scalar_lea.vmem [#allocation2], %s2120_s8 }
  0x24   : > { %v404_v33 = vshll.u32 %v2520_v21, 16  ;;  %v361_v34 = vshrl.u32 %v2539_v30, 16  ;;  %v382_v35 = vrot.slane %v380_v22, 5  ;;  %v425_v36 = vor.u32 %v424_v25, %v2524_v24  ;;  %v2555_v39 = vld [vmem:[%s2464_s10 + $0x24] sm:$0xf]  ;;  %s2370_s28 = smov [#allocation2]  }
  0x25   : > { %v364_v37 = vshll.u32 %v2539_v30, 16  ;;  %v337_v38 = vshrl.u32 %v2542_v31, 16  ;;  %v354_v40 = vrot.slane %v353_v26, 4  ;;  %v358_v41 = vrot.slane %v356_v23, 5  ;;  %v2559_v44 = vld [vmem:[%s2464_s10 + $0x18] sm:$0xf] }
  0x26   : > { %323 = vrot.lane.b32.xlu1 %v2480_v3, %s2359_s12  ;;  %319 = vrot.lane.b32.xlu0 %v2470_v1, %s2359_s12  ;;  %v430_v42 = vrot.slane %v428_v27, 5  ;;  %v401_v43 = vor.u32 %v400_v29, %v2534_v28  ;;  %v378_v45 = vrot.slane %v377_v32, 4  ;;  %v406_v46 = vrot.slane %v404_v33, 5  ;;  %s2122_s10 = sshll.u32 %s2458_s6, 3  ;;  %s2282_s8 = sshll.u32 %s2370_s28, 4  ;;  %s2283_s8 = int_to_ptr.vmem [resolvable:$false] %s2282_s8 }
  0x27   : > { %v363_v47 = vrot.slane %v361_v34, 4  ;;  %v366_v48 = vrot.slane %v364_v37, 5  ;;  %v339_v49 = vrot.slane %v337_v38, 4  ;;  %v340_v50 = vshll.u32 %v2542_v31, 16 }
  0x28   : > { %v409_v51 = vshrl.u32 %v2555_v39, 16  ;;  %v412_v52 = vshll.u32 %v2555_v39, 16  ;;  %v426_v54 = vrot.slane %v425_v36, 4  ;;  %v385_v56 = vshrl.u32 %v2559_v44, 16 }
  0x29   : > { %v367_v55 = vor.u32 %v366_v48, %v363_v47  ;;  %v388_v57 = vshll.u32 %v2559_v44, 16  ;;  %v402_v58 = vrot.slane %v401_v43, 4  ;;  %v342_v59 = vrot.slane %v340_v50, 5 }
  0x2a   : > { %331 = vrot.lane.b32.xlu1 %v2473_v2, %s2359_s12  ;;  %327 = vrot.lane.b32.xlu0 %v2467_v0, %s2359_s12  ;;  %v411_v60 = vrot.slane %v409_v51, 4  ;;  %v414_v61 = vrot.slane %v412_v52, 5  ;;  %v387_v63 = vrot.slane %v385_v56, 4  ;;  %v2582_v8 = vsel %vm2570_vm2, %v378_v45, %v382_v35 }
  0x2b   : > { %v368_v62 = vrot.slane %v367_v55, 4  ;;  %v390_v6 = vrot.slane %v388_v57, 5  ;;  %v2586_v11 = vsel %vm2570_vm2, %v354_v40, %v358_v41  ;;  %v343_v15 = vor.u32 %v342_v59, %v339_v49 }
  0x2c   : > { %v415_v16 = vor.u32 %v414_v61, %v411_v60  ;;  %v708_v19 = vshrl.u32 %v2582_v8, 16  ;;  %v707_v22 = vshrl.u32 %v2586_v11, 16  ;;  %v2592_v23 = vsel %vm2570_vm2, %v426_v54, %v430_v42 }
  0x2d   : > { %v391_v25 = vor.u32 %v390_v6, %v387_v63  ;;  %v716_v26 = vshrl.u32 %v2592_v23, 16  ;;  %v2601_v27 = vsel %vm2570_vm2, %v402_v58, %v406_v46  ;;  %v344_v29 = vrot.slane %v343_v15, 4 }
  0x2e   : > { %305 = vrot.lane.b32.xlu1 %v2539_v30, %s2358_s11  ;;  %301 = vrot.lane.b32.xlu0 %v2542_v31, %s2358_s11  ;;  %v416_v32 = vrot.slane %v415_v16, 4  ;;  %v715_v33 = vshrl.u32 %v2601_v27, 16  ;;  %v2607_v35 = vsel %vm2570_vm2, %v368_v62, %v2512_v18  ;;  %v2613_v37 = vpack.i.b16 %v422_v12, %v398_v17 }
  0x2f   : > { %v392_v36 = vrot.slane %v391_v25, 4  ;;  %v576_v40 = vshrl.u32 %v2607_v35, 16  ;;  %v2619_v41 = vsel %vm2570_vm2, %v344_v29, %v2506_v14  ;;  %v2630_v18 = vpack.i.b16 %v374_v9, %v350_v7 }
  0x30   : > { %v2624_v42 = vsel %vm2570_vm2, %v416_v32, %v2524_v24  ;;  %v575_v12 = vshrl.u32 %v2619_v41, 16  ;;  %v705_v7 = vpack.i.b16 %v2582_v8, %v2586_v11  ;;  %v2646_v9 = vpack.i.b16 %v708_v19, %v707_v22 }
  0x31   : > { %v584_v17 = vshrl.u32 %v2624_v42, 16  ;;  %v2637_v14 = vsel %vm2570_vm2, %v392_v36, %v2534_v28  ;;  %v713_v43 = vpack.i.b16 %v2592_v23, %v2601_v27  ;;  %v2650_v45 = vpack.i.b16 %v716_v26, %v715_v33 }
  0x32   : > { %313 = vrot.lane.b32.xlu1 %v2555_v39, %s2358_s11  ;;  %309 = vrot.lane.b32.xlu0 %v2559_v44, %s2358_s11  ;;  %v583_v24 = vshrl.u32 %v2637_v14, 16  ;;  %v531_v28 = vpack.i.b16 %v2539_v30, %v2542_v31  ;;  %v2658_v46 = vpack.i.b16 %v361_v34, %v337_v38  ;;  %v535_v47 = vpack.i.b16 %v2555_v39, %v2559_v44 }
  0x33   : > { %v2662_v48 = vpack.i.b16 %v409_v51, %v385_v56  ;;  %v573_v49 = vpack.i.b16 %v2607_v35, %v2619_v41  ;;  %v2666_v50 = vpack.i.b16 %v576_v40, %v575_v12  ;;  %v581_v52 = vpack.i.b16 %v2624_v42, %v2637_v14 }
  0x34   : > { %v2670_v53 = vpack.i.b16 %v584_v17, %v583_v24  ;;  %v480_v34 = vrot.slane %v2480_v3, 5  ;;  %v473_v38 = vrot.slane %v2470_v1, 5  ;;  %v483_v54 = vrot.slane %v2495_v10, 5 }
  0x35   : > { %v476_v57 = vrot.slane %v2504_v13, 5  ;;  %v494_v58 = vrot.slane %v2473_v2, 5  ;;  %v487_v59 = vrot.slane %v2467_v0, 5  ;;  %v497_v60 = vrot.slane %v2517_v20, 5 }
  0x36   : > { %321 = vrot.lane.b32.xlu1 %v2539_v30, %s2359_s12  ;;  %317 = vrot.lane.b32.xlu0 %v2542_v31, %s2359_s12  ;;  %v482_v51 = vrot.slane %v480_v34, 4  ;;  %v475_v56 = vrot.slane %v473_v38, 4  ;;  %v490_v63 = vrot.slane %v2520_v21, 5  ;;  %v2125_v21 = vrot.slane %v2539_v30, 9 }
  0x37   : > { %v496_v13 = vrot.slane %v494_v58, 4  ;;  %v489_v62 = vrot.slane %v487_v59, 4  ;;  %v2124_v15 = vrot.slane %v2542_v31, 9  ;;  %v2127_v32 = vrot.slane %v2555_v39, 9 }
  0x38   : > { %v2700_v10 = vsel %vm2687_vm5, %v482_v51, %v483_v54  ;;  %v2705_v61 = vsel %vm2687_vm5, %v475_v56, %v476_v57  ;;  %v2732_v16 = vsel %vm2687_vm5, %v2125_v21, %v480_v34  ;;  %v2126_v33 = vrot.slane %v2559_v44, 9 }
  0x39   : > { %v2714_v6 = vsel %vm2687_vm5, %v496_v13, %v497_v60  ;;  %v2718_v20 = vsel %vm2687_vm5, %v489_v62, %v490_v63  ;;  %v2736_v19 = vsel %vm2687_vm5, %v2124_v15, %v473_v38  ;;  %v624_v22 = vshrl.u32 %v2732_v16, 16 }
  0x3a   : > { %329 = vrot.lane.b32.xlu1 %v2555_v39, %s2359_s12  ;;  %325 = vrot.lane.b32.xlu0 %v2559_v44, %s2359_s12  ;;  %v623_v25 = vshrl.u32 %v2736_v19, 16  ;;  %v2764_v36 = vsel %vm2687_vm5, %v2127_v32, %v494_v58  ;;  %v2768_v40 = vsel %vm2687_vm5, %v2126_v33, %v487_v59  ;;  %v2360_v12 = vmov 1983009808  }
  0x3b   : > { %v797_v17 = vunpack.c.l.s4 %v2360_v12  ;;  %v799_v24 = vlaneseq  ;;  %v2361_v12 = vmov 1934713408  }
  0x3c   : > { %v2746_v29 = vpack.i.b16 %v624_v22, %v623_v25 }
  0x3d   : > { %v798_v51 = vunpack.c.0.s8 %v797_v17  ;;  %v800_v54 = vshrl.u32 %v799_v24, 7  ;;  %v814_v17 = vunpack.c.l.s4 %v2361_v12 }
  0x3e   : > { %438 = vrot.lane.b32.xlu1 %v2582_v8, %s2358_s11  ;;  %434 = vrot.lane.b32.xlu0 %v2586_v11, %s2358_s11 }
  0x3f   : > { %v2790_v57 = vsub.s32 %v798_v51, %v800_v54 }
  0x42   : > { %446 = vrot.lane.b32.xlu1 %v2592_v23, %s2358_s11  ;;  %442 = vrot.lane.b32.xlu0 %v2601_v27, %s2358_s11 }
  0x46   : > { %454 = vrot.lane.b32.xlu1 %v2582_v8, %s2359_s12  ;;  %450 = vrot.lane.b32.xlu0 %v2586_v11, %s2359_s12 }
  0x4a   : > { %462 = vrot.lane.b32.xlu1 %v2592_v23, %s2359_s12  ;;  %458 = vrot.lane.b32.xlu0 %v2601_v27, %s2359_s12 }
  0x4e   : > { %505 = vrot.lane.b32.xlu1 %v2700_v10, %s2358_s11  ;;  %501 = vrot.lane.b32.xlu0 %v2705_v61, %s2358_s11 }
  0x52   : > { %513 = vrot.lane.b32.xlu1 %v2714_v6, %s2358_s11  ;;  %509 = vrot.lane.b32.xlu0 %v2718_v20, %s2358_s11 }
  0x56   : > { %436 = vrot.lane.b32.xlu1 %v2607_v35, %s2358_s11  ;;  %432 = vrot.lane.b32.xlu0 %v2619_v41, %s2358_s11 }
  0x5a   : > { %444 = vrot.lane.b32.xlu1 %v2624_v42, %s2358_s11  ;;  %440 = vrot.lane.b32.xlu0 %v2637_v14, %s2358_s11 }
  0x5e   : > { %452 = vrot.lane.b32.xlu1 %v2607_v35, %s2359_s12  ;;  %448 = vrot.lane.b32.xlu0 %v2619_v41, %s2359_s12 }
  0x62   : > { %460 = vrot.lane.b32.xlu1 %v2624_v42, %s2359_s12  ;;  %456 = vrot.lane.b32.xlu0 %v2637_v14, %s2359_s12 }
  0x66   : > { %503 = vrot.lane.b32.xlu1 %v2732_v16, %s2358_s11  ;;  %499 = vrot.lane.b32.xlu0 %v2736_v19, %s2358_s11 }
  0x6a   : > { %511 = vrot.lane.b32.xlu1 %v2764_v36, %s2358_s11  ;;  %507 = vrot.lane.b32.xlu0 %v2768_v40, %s2358_s11  ;;  %s2284_s11 = scalar_lea.vmem %s2283_s8, 256 }
  0x6e   : > { %517 = vrot.lane.b32.xlu1 %v2705_v61, %s2359_s12  ;;  %515 = vrot.lane.b32.xlu0 %v2736_v19, %s2359_s12 }
  0x72   : > { %521 = vrot.lane.b32.xlu1 %v2700_v10, %s2359_s12  ;;  %519 = vrot.lane.b32.xlu0 %v2732_v16, %s2359_s12 }
  0x76   : > { %525 = vrot.lane.b32.xlu1 %v2718_v20, %s2359_s12  ;;  %523 = vrot.lane.b32.xlu0 %v2768_v40, %s2359_s12 }
  0x7a   : > { %529 = vrot.lane.b32.xlu1 %v2714_v6, %s2359_s12  ;;  %527 = vrot.lane.b32.xlu0 %v2764_v36, %s2359_s12 }
  0x90   : > { %v312_v34 = vpop.permute.xlu1 %311  ;;  %v304_v38 = vpop.permute.xlu0 %303 }
  0x91   : > { %v683_v55 = vshrl.u32 %v312_v34, 16  ;;  %v675_v56 = vshrl.u32 %v304_v38, 16 }
  0x94   : > { %v316_v58 = vpop.permute.xlu1 %315  ;;  %v308_v59 = vpop.permute.xlu0 %307 }
  0x95   : > { %v681_v60 = vpack.i.b16 %v316_v58, %v312_v34  ;;  %v684_v13 = vshrl.u32 %v316_v58, 16  ;;  %v673_v62 = vpack.i.b16 %v308_v59, %v304_v38  ;;  %v676_v63 = vshrl.u32 %v308_v59, 16 }
  0x97   : > { %v685_v21 = vpack.i.b16 %v684_v13, %v683_v55  ;;  %v1143_v15 = vcombine.low %v667_v4, %v681_v60  ;;  %v677_v22 = vpack.i.b16 %v676_v63, %v675_v56  ;;  %v1135_v25 = vcombine.low %v663_v5, %v673_v62 }
  0x98   : > { %v324_v32 = vpop.permute.xlu1 %323  ;;  %v320_v33 = vpop.permute.xlu0 %319  ;;  %v815_v60 = vunpack.c.0.s8 %v814_v17 }
  0x99   : > { %v1150_v24 = vrot.slane %v1143_v15, %v2790_v57  ;;  %v1177_v34 = vcombine.low %v2613_v37, %v685_v21  ;;  %v1142_v38 = vrot.slane %v1135_v25, %v2790_v57  ;;  %v1169_v51 = vcombine.low %v2630_v18, %v677_v22 }
  0x9a   : > { %v692_v55 = vshrl.u32 %v324_v32, 16  ;;  %v689_v0 = vpack.i.b16 %v324_v32, %v320_v33  ;;  %v691_v2 = vshrl.u32 %v320_v33, 16  ;;  %v2820_v32 = vsub.s32 %v815_v60, %v800_v54 }
  0x9b   : > { %v2803_v4 = vrot.slane %v1177_v34, %v2790_v57  ;;  %v1151_v1 = vcombine.low %v1142_v38, %v1150_v24  ;;  %v1152_v3 = vcombine.high %v1142_v38, %v1150_v24  ;;  %v2806_v5 = vrot.slane %v1169_v51, %v2790_v57 }
  0x9c   : > { %v693_v56 = vpack.i.b16 %v692_v55, %v691_v2  ;;  %v1203_v37 = vcombine.low %v689_v0, %v705_v7  ;;  %v332_v58 = vpop.permute.xlu1 %331  ;;  %v328_v59 = vpop.permute.xlu0 %327 }
  0x9d   : > { %v700_v18 = vshrl.u32 %v332_v58, 16  ;;  %v697_v13 = vpack.i.b16 %v332_v58, %v328_v59  ;;  %v699_v62 = vshrl.u32 %v328_v59, 16  ;;  %v1185_v63 = vcombine.low %v2806_v5, %v2803_v4 }
  0x9e   : > { %v1186_v22 = vcombine.high %v2806_v5, %v2803_v4  ;;  %v1210_v8 = vrot.slane %v1203_v37, %v2790_v57  ;;  %v1237_v11 = vcombine.low %v693_v56, %v2646_v9  ;;  %v2830_v0 = vrot.slane %v1151_v1, %v2820_v32 }
  0x9f   : > { %v701_v21 = vpack.i.b16 %v700_v18, %v699_v62  ;;  %v1211_v15 = vcombine.low %v697_v13, %v713_v43  ;;  %v2833_v5 = vrot.slane %v1152_v3, %v2820_v32  ;;  %v1193_v31 = vrot.slane %v1185_v63, %v2820_v32 }
  0xa0   : > { %v306_v7 = vpop.permute.xlu1 %305  ;;  %v302_v25 = vpop.permute.xlu0 %301  ;;  %v1244_v9 = vrot.slane %v1237_v11, %v2790_v57 }
  0xa1   : > { %v1218_v33 = vrot.slane %v1211_v15, %v2790_v57  ;;  %v1245_v12 = vcombine.low %v701_v21, %v2650_v45  ;;  %v544_v17 = vshrl.u32 %v306_v7, 16  ;;  %v541_v24 = vpack.i.b16 %v306_v7, %v302_v25 }
  0xa2   : > { %v543_v34 = vshrl.u32 %v302_v25, 16 }
  0xa3   : > { %v1219_v23 = vcombine.low %v1210_v8, %v1218_v33  ;;  %v1220_v27 = vcombine.high %v1210_v8, %v1218_v33  ;;  %v1252_v43 = vrot.slane %v1245_v12, %v2790_v57  ;;  %v795_v38 = vcombine.low %v531_v28, %v541_v24 }
  0xa4   : > { %v545_v51 = vpack.i.b16 %v544_v17, %v543_v34  ;;  %v314_v54 = vpop.permute.xlu1 %313  ;;  %v310_v55 = vpop.permute.xlu0 %309  ;;  %v2859_v12 = vrot.slane %v1186_v22, %v2820_v32 }
  0xa5   : > { %v552_v45 = vshrl.u32 %v314_v54, 16  ;;  %v549_v2 = vpack.i.b16 %v314_v54, %v310_v55  ;;  %v551_v4 = vshrl.u32 %v310_v55, 16  ;;  %v2836_v56 = vrot.slane %v1219_v23, %v2820_v32 }
  0xa6   : > { %v2839_v30 = vrot.slane %v1220_v27, %v2820_v32  ;;  %v1253_v28 = vcombine.low %v1244_v9, %v1252_v43  ;;  %v802_v37 = vrot.slane %v795_v38, %v2790_v57  ;;  %v1254_v59 = vcombine.high %v1244_v9, %v1252_v43 }
  0xa7   : > { %v553_v58 = vpack.i.b16 %v552_v45, %v551_v4  ;;  %v803_v1 = vcombine.low %v535_v47, %v549_v2  ;;  %v829_v3 = vcombine.low %v2658_v46, %v545_v51  ;;  %v2196_v13 = vcombine.high %v2830_v0, %v2836_v56 }
  0xa8   : > { %v322_v60 = vpop.permute.xlu1 %321  ;;  %v318_v18 = vpop.permute.xlu0 %317  ;;  %v2164_v62 = vcombine.low %v2833_v5, %v2839_v30  ;;  %v1261_v63 = vrot.slane %v1253_v28, %v2820_v32  ;;  %v2202_v11 = vcombine.high %v2833_v5, %v2839_v30  ;;  %v2863_v23 = vrot.slane %v1254_v59, %v2820_v32 }
  0xa9   : > { %v810_v21 = vrot.slane %v803_v1, %v2790_v57  ;;  %v837_v15 = vcombine.low %v2662_v48, %v553_v58  ;;  %v560_v8 = vshrl.u32 %v322_v60, 16  ;;  %v557_v39 = vpack.i.b16 %v322_v60, %v318_v18  ;;  %1666 = vrot.lane.b32.xlu0 %v2196_v13, %s2362_s13 }
  0xaa   : > { %v559_v44 = vshrl.u32 %v318_v18, 16  ;;  %v2155_v46 = vcombine.low %v1193_v31, %v1261_v63  ;;  %v2199_v47 = vcombine.high %v1193_v31, %v1261_v63  ;;  %v836_v48 = vrot.slane %v829_v3, %v2790_v57 }
  0xab   : > { %v811_v7 = vcombine.low %v802_v37, %v810_v21  ;;  %v812_v25 = vcombine.high %v802_v37, %v810_v21  ;;  %v844_v33 = vrot.slane %v837_v15, %v2790_v57  ;;  %v863_v43 = vcombine.low %v557_v39, %v573_v49 }
  0xac   : > { %v561_v17 = vpack.i.b16 %v560_v8, %v559_v44  ;;  %v330_v24 = vpop.permute.xlu1 %329  ;;  %v326_v34 = vpop.permute.xlu0 %325  ;;  %v2167_v45 = vcombine.low %v2859_v12, %v2863_v23  ;;  %v2205_v49 = vcombine.high %v2859_v12, %v2863_v23  ;;  %v3375_v23 = vpack.i.b16 %v2732_v16, %v2736_v19 }
  0xad   : > { %v568_v38 = vshrl.u32 %v330_v24, 16  ;;  %v565_v9 = vpack.i.b16 %v330_v24, %v326_v34  ;;  %v567_v51 = vshrl.u32 %v326_v34, 16  ;;  %1704 = vrot.lane.b32.xlu0 %v2164_v62, %s2363_s14  ;;  %v845_v22 = vcombine.low %v836_v48, %v844_v33 }
  0xae   : > { %v846_v2 = vcombine.high %v836_v48, %v844_v33  ;;  %v897_v4 = vcombine.low %v561_v17, %v2666_v50  ;;  %v870_v31 = vrot.slane %v863_v43, %v2790_v57  ;;  %v2894_v59 = vrot.slane %v811_v7, %v2820_v32 }
  0xaf   : > { %v569_v54 = vpack.i.b16 %v568_v38, %v567_v51  ;;  %v871_v55 = vcombine.low %v565_v9, %v581_v52  ;;  %v853_v63 = vrot.slane %v845_v22, %v2820_v32 }
  0xb0   : > { %v2877_v35 = vpop.permute.xlu1 %438  ;;  %v2879_v41 = vpop.permute.xlu0 %434  ;;  %v904_v37 = vrot.slane %v897_v4, %v2790_v57  ;;  %3371 = vst [vmem:[#allocation5_spill] sm:$0xff] %v2894_v59  ;;  %v2906_v21 = vrot.slane %v846_v2, %v2820_v32  ;;  %v753_v2 = vpack.i.b16 %v2700_v10, %v2705_v61 }
  0xb1   : > { %v878_v28 = vrot.slane %v871_v55, %v2790_v57  ;;  %v905_v42 = vcombine.low %v569_v54, %v2670_v53  ;;  %1647 = vrot.lane.b32.xlu0 %v2155_v46, %s2364_s15  ;;  %v826_v53 = vrot.slane %v812_v25, %v2820_v32  ;;  %v721_v54 = vpack.i.b16 %v2877_v35, %v2879_v41 }
  0xb3   : > { %v879_v14 = vcombine.low %v870_v31, %v878_v28  ;;  %v880_v52 = vcombine.high %v870_v31, %v878_v28  ;;  %v912_v50 = vrot.slane %v905_v42, %v2790_v57  ;;  %v761_v28 = vpack.i.b16 %v2714_v6, %v2718_v20 }
  0xb4   : > { %v2889_v58 = vpop.permute.xlu1 %446  ;;  %v2891_v1 = vpop.permute.xlu0 %442 }
  0xb5   : > { %v2897_v3 = vrot.slane %v879_v14, %v2820_v32  ;;  %1685 = vrot.lane.b32.xlu0 %v2199_v47, %s2365_s16  ;;  %v894_v60 = vrot.slane %v880_v52, %v2820_v32  ;;  %v913_v18 = vcombine.low %v904_v37, %v912_v50  ;;  %v914_v13 = vcombine.high %v904_v37, %v912_v50 }
  0xb6   : > { %v729_v38 = vpack.i.b16 %v2889_v58, %v2891_v1 }
  0xb7   : > { %3372 = vst [vmem:[#allocation6_spill] sm:$0xff] %v2897_v3  ;;  %v2184_v62 = vcombine.high %v2894_v59, %v2897_v3  ;;  %v2140_v44 = vcombine.low %v826_v53, %v894_v60  ;;  %v2190_v46 = vcombine.high %v826_v53, %v894_v60  ;;  %v921_v47 = vrot.slane %v913_v18, %v2820_v32 }
  0xb8   : > { %v2910_v8 = vpop.permute.xlu1 %454  ;;  %v2912_v39 = vpop.permute.xlu0 %450  ;;  %v2916_v7 = vrot.slane %v914_v13, %v2820_v32 }
  0xb9   : > { %1520 = vrot.lane.b32.xlu1 %v2184_v62, %s2362_s13  ;;  %v2131_v25 = vcombine.low %v853_v63, %v921_v47  ;;  %v2187_v33 = vcombine.high %v853_v63, %v921_v47  ;;  %v737_v9 = vpack.i.b16 %v2910_v8, %v2912_v39 }
  0xba   : > { %v2143_v48 = vcombine.low %v2906_v21, %v2916_v7 }
  0xbb   : > { %v1271_v31 = vcombine.low %v721_v54, %v737_v9  ;;  %v755_v54 = vshrl.u32 %v2705_v61, 16  ;;  %v740_v61 = vshrl.u32 %v2910_v8, 16 }
  0xbc   : > { %v2923_v24 = vpop.permute.xlu1 %462  ;;  %v2925_v34 = vpop.permute.xlu0 %458 }
  0xbd   : > { %v745_v43 = vpack.i.b16 %v2923_v24, %v2925_v34  ;;  %1558 = vrot.lane.b32.xlu1 %v2140_v44, %s2363_s14  ;;  %v2961_v5 = vrot.slane %v1271_v31, %v2790_v57 }
  0xbf   : > { %v1279_v55 = vcombine.low %v729_v38, %v745_v43 }
  0xc0   : > { %v2934_v51 = vpop.permute.xlu1 %505  ;;  %v2936_v22 = vpop.permute.xlu0 %501 }
  0xc1   : > { %v769_v4 = vpack.i.b16 %v2934_v51, %v2936_v22  ;;  %1742 = vrot.lane.b32.xlu1 %v2202_v11, %s2366_s17  ;;  %v2955_v52 = vrot.slane %v1279_v55, %v2790_v57  ;;  %v764_v55 = vshrl.u32 %v2714_v6, 16  ;;  %v739_v6 = vshrl.u32 %v2912_v39, 16 }
  0xc3   : > { %v1339_v50 = vcombine.low %v753_v2, %v769_v4  ;;  %v1287_v60 = vcombine.low %v2961_v5, %v2955_v52  ;;  %v763_v2 = vshrl.u32 %v2718_v20, 16  ;;  %v741_v27 = vpack.i.b16 %v740_v61, %v739_v6 }
  0xc4   : > { %v2950_v42 = vpop.permute.xlu1 %513  ;;  %v2952_v14 = vpop.permute.xlu0 %509 }
  0xc5   : > { %v777_v37 = vpack.i.b16 %v2950_v42, %v2952_v14  ;;  %1596 = vrot.lane.b32.xlu1 %v2190_v46, %s2366_s17  ;;  %v2970_v18 = vrot.slane %v1339_v50, %v2790_v57  ;;  %v2984_v46 = vrot.slane %v1287_v60, %v2820_v32  ;;  %v631_v50 = vshrl.u32 %v2768_v40, 16 }
  0xc6   : > { %v747_v60 = vshrl.u32 %v2925_v34, 16 }
  0xc7   : > { %v1347_v30 = vcombine.low %v761_v28, %v777_v37  ;;  %3373 = vst [vmem:[#allocation7_spill] sm:$0xff] %v2984_v46  ;;  %v632_v28 = vshrl.u32 %v2764_v36, 16  ;;  %v724_v37 = vshrl.u32 %v2877_v35, 16  ;;  %v771_v35 = vshrl.u32 %v2936_v22, 16 }
  0xc8   : > { %v2963_v11 = vpop.permute.xlu1 %436  ;;  %v2965_v53 = vpop.permute.xlu0 %432  ;;  %v765_v22 = vpack.i.b16 %v764_v55, %v763_v2  ;;  %v3376_v55 = vcombine.high %v2906_v21, %v2916_v7 }
  0xc9   : > { %v2973_v13 = vrot.slane %v1347_v30, %v2790_v57  ;;  %1501 = vrot.lane.b32.xlu1 %v2131_v25, %s2364_s15  ;;  %v748_v30 = vshrl.u32 %v2923_v24, 16  ;;  %v731_v24 = vshrl.u32 %v2891_v1, 16  ;;  %v629_v1 = vpack.i.b16 %v2764_v36, %v2768_v40 }
  0xca   : > { %v633_v40 = vpack.i.b16 %v632_v28, %v631_v50 }
  0xcb   : > { %v1355_v62 = vcombine.low %v2970_v18, %v2973_v13  ;;  %v749_v17 = vpack.i.b16 %v748_v30, %v747_v60 }
  0xcc   : > { %v2978_v63 = vpop.permute.xlu1 %444  ;;  %v2980_v44 = vpop.permute.xlu0 %440 }
  0xcd   : > { %1539 = vrot.lane.b32.xlu1 %v2187_v33, %s2365_s16  ;;  %v2987_v47 = vrot.slane %v1355_v62, %v2820_v32  ;;  %v756_v33 = vshrl.u32 %v2700_v10, 16  ;;  %v732_v10 = vshrl.u32 %v2889_v58, 16  ;;  %v772_v62 = vshrl.u32 %v2934_v51, 16 }
  0xce   : > { %v597_v58 = vpack.i.b16 %v2978_v63, %v2980_v44 }
  0xcf   : > { %3374 = vst [vmem:[#allocation8_spill] sm:$0xff] %v2987_v47  ;;  %v2197_v43 = vcombine.high %v2984_v46, %v2987_v47  ;;  %v757_v51 = vpack.i.b16 %v756_v33, %v755_v54  ;;  %v773_v26 = vpack.i.b16 %v772_v62, %v771_v35  ;;  %v733_v12 = vpack.i.b16 %v732_v10, %v731_v24 }
  0xd0   : > { %v2993_v38 = vpop.permute.xlu1 %452  ;;  %v2995_v9 = vpop.permute.xlu0 %448 }
  0xd1   : > { %1668 = vrot.lane.b32.xlu0 %v2197_v43, %s2362_s13  ;;  %1723 = vrot.lane.b32.xlu1 %v2167_v45, %s2367_s23  ;;  %v723_v45 = vshrl.u32 %v2879_v41, 16  ;;  %v780_v41 = vshrl.u32 %v2950_v42, 16  ;;  %v605_v8 = vpack.i.b16 %v2993_v38, %v2995_v9  ;;  %v589_v42 = vpack.i.b16 %v2963_v11, %v2965_v53 }
  0xd2   : > { %v607_v50 = vshrl.u32 %v2995_v9, 16  ;;  %v592_v9 = vshrl.u32 %v2963_v11, 16 }
  0xd3   : > { %v931_v47 = vcombine.low %v589_v42, %v605_v8 }
  0xd4   : > { %v3006_v4 = vpop.permute.xlu1 %460  ;;  %v3008_v31 = vpop.permute.xlu0 %456 }
  0xd5   : > { %1577 = vrot.lane.b32.xlu1 %v2143_v48, %s2367_s23  ;;  %v613_v20 = vpack.i.b16 %v3006_v4, %v3008_v31  ;;  %v779_v48 = vshrl.u32 %v2952_v14, 16  ;;  %v3050_v16 = vrot.slane %v931_v47, %v2790_v57  ;;  %v616_v7 = vshrl.u32 %v3006_v4, 16 }
  0xd6   : > { %v615_v28 = vshrl.u32 %v3008_v31, 16  ;;  %v608_v47 = vshrl.u32 %v2993_v38, 16  ;;  %v1288_v31 = vcombine.high %v2961_v5, %v2955_v52  ;;  %v591_v52 = vshrl.u32 %v2965_v53, 16 }
  0xd7   : > { %v939_v14 = vcombine.low %v597_v58, %v613_v20  ;;  %v1356_v20 = vcombine.high %v2970_v18, %v2973_v13 }
  0xd8   : > { %v504_v39 = vpop.permute.xlu1 %503  ;;  %v500_v43 = vpop.permute.xlu0 %499  ;;  %v617_v5 = vpack.i.b16 %v616_v7, %v615_v28  ;;  %v593_v42 = vpack.i.b16 %v592_v9, %v591_v52 }
  0xd9   : > { %v640_v25 = vshrl.u32 %v504_v39, 16  ;;  %v637_v34 = vpack.i.b16 %v504_v39, %v500_v43  ;;  %v639_v15 = vshrl.u32 %v500_v43, 16  ;;  %1761 = vrot.lane.b32.xlu1 %v2205_v49, %s2368_s24  ;;  %v725_v39 = vpack.i.b16 %v724_v37, %v723_v45 }
  0xda   : > { %v781_v43 = vpack.i.b16 %v780_v41, %v779_v48  ;;  %v3047_v36 = vrot.slane %v939_v14, %v2790_v57  ;;  %v1373_v37 = vcombine.low %v757_v51, %v773_v26  ;;  %v609_v48 = vpack.i.b16 %v608_v47, %v607_v50 }
  0xdb   : > { %v641_v46 = vpack.i.b16 %v640_v25, %v639_v15  ;;  %v999_v49 = vcombine.low %v3375_v23, %v637_v34  ;;  %v1305_v15 = vcombine.low %v725_v39, %v741_v27  ;;  %v1313_v25 = vcombine.low %v733_v12, %v749_v17 }
  0xdc   : > { %v512_v3 = vpop.permute.xlu1 %511  ;;  %v508_v59 = vpop.permute.xlu0 %507  ;;  %v1381_v10 = vcombine.low %v765_v22, %v781_v43  ;;  %v599_v17 = vshrl.u32 %v2980_v44, 16  ;;  %v3100_v11 = vrot.slane %v1373_v37, %v2790_v57  ;;  %v3108_v51 = vrot.slane %v1288_v31, %v2820_v32 }
  0xdd   : > { %v648_v33 = vshrl.u32 %v512_v3, 16  ;;  %v645_v54 = vpack.i.b16 %v512_v3, %v508_v59  ;;  %1615 = vrot.lane.b32.xlu1 %v3376_v55, %s2368_s24  ;;  %v647_v2 = vshrl.u32 %v508_v59, 16  ;;  %v1033_v19 = vcombine.low %v2746_v29, %v641_v46 }
  0xde   : > { %v1006_v27 = vrot.slane %v999_v49, %v2790_v57  ;;  %v600_v59 = vshrl.u32 %v2978_v63, 16  ;;  %v947_v29 = vcombine.low %v3050_v16, %v3047_v36  ;;  %v3082_v38 = vrot.slane %v1381_v10, %v2790_v57 }
  0xdf   : > { %v1007_v45 = vcombine.low %v629_v1, %v645_v54  ;;  %v649_v3 = vpack.i.b16 %v648_v33, %v647_v2  ;;  %v3072_v63 = vrot.slane %v1033_v19, %v2790_v57  ;;  %v3097_v41 = vrot.slane %v1305_v15, %v2790_v57 }
  0xe0   : > { %v3053_v61 = vpop.permute.xlu1 %517  ;;  %v3055_v21 = vpop.permute.xlu0 %515  ;;  %v3087_v18 = vrot.slane %v947_v29, %v2820_v32  ;;  %v601_v53 = vpack.i.b16 %v600_v59, %v599_v17  ;;  %v3103_v58 = vrot.slane %v1313_v25, %v2790_v57  ;;  %v3111_v22 = vrot.slane %v1356_v20, %v2820_v32 }
  0xe1   : > { %v1014_v26 = vrot.slane %v1007_v45, %v2790_v57  ;;  %v1041_v46 = vcombine.low %v633_v40, %v649_v3  ;;  %v948_v14 = vcombine.high %v3050_v16, %v3047_v36  ;;  %v1389_v39 = vcombine.low %v3100_v11, %v3082_v38 }
  0xe2   : > { %v973_v1 = vcombine.low %v601_v53, %v617_v5  ;;  %v786_v43 = vshrl.u32 %v3053_v61, 16  ;;  %v654_v12 = vshrl.u32 %v3055_v21, 16  ;;  %v965_v33 = vcombine.low %v593_v42, %v609_v48 }
  0xe3   : > { %v1015_v6 = vcombine.low %v1006_v27, %v1014_v26  ;;  %v1016_v4 = vcombine.high %v1006_v27, %v1014_v26  ;;  %v3075_v44 = vrot.slane %v1041_v46, %v2790_v57  ;;  %v2165_v15 = vcombine.low %v3108_v51, %v3111_v22 }
  0xe4   : > { %v3077_v30 = vpop.permute.xlu1 %521  ;;  %v3079_v60 = vpop.permute.xlu0 %519  ;;  %v3130_v37 = vrot.slane %v973_v1, %v2790_v57  ;;  %v1321_v16 = vcombine.low %v3097_v41, %v3103_v58  ;;  %v3136_v7 = vrot.slane %v948_v14, %v2820_v32  ;;  %v972_v28 = vrot.slane %v965_v33, %v2790_v57 }
  0xe5   : > { %v3090_v13 = vrot.slane %v1015_v6, %v2820_v32  ;;  %v1049_v62 = vcombine.low %v3072_v63, %v3075_v44  ;;  %v1050_v35 = vcombine.high %v3072_v63, %v3075_v44  ;;  %v787_v23 = vshrl.u32 %v3077_v30, 16 }
  0xe6   : > { %v655_v49 = vshrl.u32 %v3079_v60, 16  ;;  %v3127_v25 = vrot.slane %v1016_v4, %v2820_v32  ;;  %v1397_v59 = vrot.slane %v1389_v39, %v2820_v32  ;;  %v1329_v47 = vrot.slane %v1321_v16, %v2820_v32 }
  0xe7   : > { %v2185_v34 = vcombine.high %v3087_v18, %v3090_v13  ;;  %v2129_v36 = vcombine.low %v3087_v18, %v3090_v13  ;;  %v788_v19 = vpack.i.b16 %v787_v23, %v786_v43  ;;  %v981_v50 = vcombine.low %v972_v28, %v3130_v37 }
  0xe8   : > { %v526_v8 = vpop.permute.xlu1 %525  ;;  %v524_v24 = vpop.permute.xlu0 %523  ;;  %v656_v3 = vpack.i.b16 %v655_v49, %v654_v12  ;;  %v2141_v29 = vcombine.low %v3136_v7, %v3127_v25  ;;  %v653_v4 = vpack.i.b16 %v3079_v60, %v3055_v21  ;;  %v2156_v9 = vcombine.low %v1329_v47, %v1397_v59 }
  0xe9   : > { %1522 = vrot.lane.b32.xlu0 %v2185_v34, %s2362_s13  ;;  %v792_v54 = vshrl.u32 %v526_v8, 16  ;;  %v660_v55 = vshrl.u32 %v524_v24, 16  ;;  %v3148_v6 = vrot.slane %v788_v19, %v2790_v57  ;;  %v1057_v52 = vrot.slane %v1049_v62, %v2820_v32 }
  0xea   : > { %v3153_v31 = vrot.slane %v656_v3, %v2790_v57  ;;  %v989_v60 = vrot.slane %v981_v50, %v2820_v32  ;;  %v1074_v34 = vrot.slane %v653_v4, %v2790_v57  ;;  %v2200_v12 = vcombine.high %v1329_v47, %v1397_v59 }
  0xeb   : > { %v2203_v19 = vcombine.high %v3108_v51, %v3111_v22  ;;  %v2369_v47 = vmov 0  }
  0xec   : > { %v530_v40 = vpop.permute.xlu1 %529  ;;  %v528_v2 = vpop.permute.xlu0 %527  ;;  %v2188_v33 = vcombine.high %v989_v60, %v1057_v52  ;;  %1910 = vmatprep.mubr.bf16.mxu0 %v2369_v47 }
  0xed   : > { %v793_v45 = vshrl.u32 %v530_v40, 16  ;;  %v661_v10 = vshrl.u32 %v528_v2, 16  ;;  %1706 = vrot.lane.b32.xlu0 %v2165_v15, %s2363_s14  ;;  %v659_v17 = vpack.i.b16 %v528_v2, %v524_v24  ;;  %v791_v5 = vpack.i.b16 %v530_v40, %v526_v8 }
  0xee   : > { %v785_v24 = vpack.i.b16 %v3077_v30, %v3053_v61  ;;  %v2132_v8 = vcombine.low %v989_v60, %v1057_v52  ;;  %v1390_v61 = vcombine.high %v3100_v11, %v3082_v38  ;;  %v982_v40 = vcombine.high %v972_v28, %v3130_v37 }
  0xef   : > { %v794_v27 = vpack.i.b16 %v793_v45, %v792_v54  ;;  %v662_v26 = vpack.i.b16 %v661_v10, %v660_v55  ;;  %v1082_v48 = vrot.slane %v659_v17, %v2790_v57  ;;  %v1422_v42 = vrot.slane %v791_v5, %v2790_v57 }
  0xf0   : > { %v1414_v43 = vrot.slane %v785_v24, %v2790_v57  ;;  %v1404_v55 = vrot.slane %v1390_v61, %v2820_v32  ;;  %v996_v15 = vrot.slane %v982_v40, %v2820_v32  ;;  %v3377_v60 = vcombine.low %v2830_v0, %v2836_v56 }
  0xf1   : > { %v3143_v46 = vrot.slane %v794_v27, %v2790_v57  ;;  %v3156_v20 = vrot.slane %v662_v26, %v2790_v57  ;;  %1560 = vrot.lane.b32.xlu0 %v2141_v29, %s2363_s14  ;;  %v1083_v14 = vcombine.low %v1074_v34, %v1082_v48  ;;  %v1322_v57 = vcombine.high %v3097_v41, %v3103_v58 }
  0xf2   : > { %v1423_v30 = vcombine.low %v1414_v43, %v1422_v42  ;;  %v1064_v58 = vrot.slane %v1050_v35, %v2820_v32  ;;  %v1084_v45 = vcombine.high %v1074_v34, %v1082_v48  ;;  %v1424_v37 = vcombine.high %v1414_v43, %v1422_v42 }
  0xf3   : > { %v1457_v53 = vcombine.low %v3148_v6, %v3143_v46  ;;  %v1117_v21 = vcombine.low %v3153_v31, %v3156_v20  ;;  %v3179_v49 = vrot.slane %v1083_v14, %v2820_v32  ;;  %v1336_v11 = vrot.slane %v1322_v57, %v2820_v32  ;;  %v3378_v14 = vld [vmem:[#allocation5_spill] sm:$0xff] }
  0xf4   : > { %v3189_v38 = vrot.slane %v1423_v30, %v2820_v32  ;;  %v2144_v10 = vcombine.low %v996_v15, %v1064_v58  ;;  %v1098_v63 = vrot.slane %v1084_v45, %v2820_v32  ;;  %v1458_v44 = vcombine.high %v3148_v6, %v3143_v46 }
  0xf5   : > { %1649 = vrot.lane.b32.xlu0 %v2156_v9, %s2364_s15  ;;  %v1125_v62 = vrot.slane %v1117_v21, %v2820_v32  ;;  %v1465_v39 = vrot.slane %v1457_v53, %v2820_v32  ;;  %v2186_v54 = vcombine.high %v3179_v49, %v3179_v49  ;;  %v2168_v2 = vcombine.low %v1336_v11, %v1404_v55 }
  0xf6   : > { %v2198_v41 = vcombine.high %v3189_v38, %v3189_v38  ;;  %v2191_v35 = vcombine.high %v3136_v7, %v3127_v25  ;;  %v2142_v28 = vcombine.low %v1098_v63, %v1098_v63  ;;  %v1438_v27 = vrot.slane %v1424_v37, %v2820_v32 }
  0xf7   : > { %v2133_v1 = vcombine.low %v1125_v62, %v1125_v62  ;;  %v2157_v23 = vcombine.low %v1465_v39, %v1465_v39  ;;  %v2189_v16 = vcombine.high %v1125_v62, %v1125_v62  ;;  %v2201_v3 = vcombine.high %v1465_v39, %v1465_v39 }
  0xf8   : > { %v1118_v51 = vcombine.high %v3153_v31, %v3156_v20  ;;  %v2206_v22 = vcombine.high %v1336_v11, %v1404_v55  ;;  %v2166_v26 = vcombine.low %v1438_v27, %v1438_v27  ;;  %v1472_v59 = vrot.slane %v1458_v44, %v2820_v32 }
  0xf9   : > { %1503 = vrot.lane.b32.xlu0 %v2132_v8, %s2364_s15  ;;  %1505 = vrot.lane.b32.xlu1 %v2133_v1, %s2364_s15  ;;  %v2194_v17 = vcombine.high %v996_v15, %v1064_v58  ;;  %v2204_v46 = vcombine.high %v1438_v27, %v1438_v27  ;;  %v2192_v50 = vcombine.high %v1098_v63, %v1098_v63  ;;  %v3379_v1 = vld [vmem:[#allocation6_spill] sm:$0xff] }
  0xfa   : > { %v2169_v25 = vcombine.low %v1472_v59, %v1472_v59  ;;  %v1132_v7 = vrot.slane %v1118_v51, %v2820_v32  ;;  %v2207_v6 = vcombine.high %v1472_v59, %v1472_v59  ;;  %v3380_v39 = vcombine.low %v3378_v14, %v3379_v1 }
  0xfb   : > { %v2130_v14 = vcombine.low %v3179_v49, %v3179_v49 }
  0xfc   : > { %v2145_v29 = vcombine.low %v1132_v7, %v1132_v7  ;;  %v2195_v4 = vcombine.high %v1132_v7, %v1132_v7 }
  0xfd   : > { %1687 = vrot.lane.b32.xlu0 %v2200_v12, %s2365_s16  ;;  %1651 = vrot.lane.b32.xlu1 %v2157_v23, %s2364_s15 }
 0x101   : > { %1541 = vrot.lane.b32.xlu0 %v2188_v33, %s2365_s16  ;;  %1524 = vrot.lane.b32.xlu1 %v2186_v54, %s2362_s13 }
 0x105   : > { %1725 = vrot.lane.b32.xlu0 %v2168_v2, %s2367_s23  ;;  %1670 = vrot.lane.b32.xlu1 %v2198_v41, %s2362_s13  ;;  %s267_s13 = scalar_lea.vmem %s3359_s4, %s2122_s10 }
 0x109   : > { %1579 = vrot.lane.b32.xlu0 %v2144_v10, %s2367_s23  ;;  %1543 = vrot.lane.b32.xlu1 %v2189_v16, %s2365_s16 }
 0x10d   : > { %1744 = vrot.lane.b32.xlu0 %v2203_v19, %s2366_s17  ;;  %1689 = vrot.lane.b32.xlu1 %v2201_v3, %s2365_s16 }
 0x111   : > { %1598 = vrot.lane.b32.xlu0 %v2191_v35, %s2366_s17  ;;  %1562 = vrot.lane.b32.xlu1 %v2142_v28, %s2363_s14 }
 0x115   : > { %1763 = vrot.lane.b32.xlu0 %v2206_v22, %s2368_s24  ;;  %1708 = vrot.lane.b32.xlu1 %v2166_v26, %s2363_s14  ;;  %v3381_v22 = vld [vmem:[#allocation7_spill] sm:$0xff]  ;;  %v3382_v26 = vld [vmem:[#allocation8_spill] sm:$0xff]  ;;  %s2209_s14 = sshll.u32 %s2348_s21, 7 }
 0x116   : > { %v3383_v59 = vcombine.low %v3381_v22, %v3382_v26 }
 0x119   : > { %1617 = vrot.lane.b32.xlu0 %v2194_v17, %s2368_s24  ;;  %1727 = vrot.lane.b32.xlu1 %v2169_v25, %s2367_s23 }
 0x11b   : > { %v1667_v31 = vpop.permute.xlu0 %1666 }
 0x11d   : > { %1581 = vrot.lane.b32.xlu0 %v2145_v29, %s2367_s23  ;;  %1746 = vrot.lane.b32.xlu1 %v2204_v46, %s2366_s17  ;;  %s1975_s23 = sshll.u32 %s236_s9, 4  ;;  %s1976_s23 = int_to_ptr.vmem [resolvable:$true] %s1975_s23 }
 0x11e   : > { %s2278_s26 = scalar_lea.vmem %s1976_s23, 128  ;;  %p2285_p1 = scmp.lt.s32.totalorder %s1976_s23, %s2283_s8 }
 0x11f   : > { %v1705_v52 = vpop.permute.xlu0 %1704  ;;  %p2279_p12 = scmp.ne.s32.totalorder %s1976_s23, %s2278_s26  ;;  %p2286_p2 = scmp.lt.s32.totalorder %s2284_s11, %s2278_s26 }
 0x121   : > { %1600 = vrot.lane.b32.xlu0 %v2192_v50, %s2366_s17  ;;  %1765 = vrot.lane.b32.xlu1 %v2207_v6, %s2368_s24  ;;  %s3306_s17 = scalar_lea.hbm %s3358_s3, %s2209_s14  ;;  %p2280_p13 = pnand %p2279_p12, %p2441_p4 }
 0x122   : > { %p2287_p3 = por %p2286_p2, %p2285_p1 }
 0x123   : > { %v1648_v53 = vpop.permute.xlu0 %1647  ;;  %p2281_p0 = pneg %p2280_p13 }
 0x124   : > { %v1823_v24 = vsel %vm1767_vm6, %v3377_v60, %v1648_v53  ;;  %v2154_v60 = vcombine.low %v3189_v38, %v3189_v38 }
 0x125   : > { %1619 = vrot.lane.b32.xlu0 %v2195_v4, %s2368_s24  ;;  %v1831_v62 = vsel %vm1777_vm7, %v1823_v24, %v1667_v31  ;;  %s1945_s24 = scalar_lea.sflag [#allocation3], %s234_s7  ;;  %p2288_p5 = pnand %p2287_p3, %p2281_p0 }
 0x127   : > { %v1686_v34 = vpop.permute.xlu0 %1685 }
 0x128   : > { %v1837_v42 = vsel %vm1784_vm8, %v1831_v62, %v1686_v34 }
 0x129   : > { %v1843_v0 = vsel %vm1791_vm9, %v1837_v42, %v1705_v52 }
 0x12b   : > { %v1521_v32 = vpop.permute.xlu1 %1520 }
 0x12f   : > { %v1559_v20 = vpop.permute.xlu1 %1558 }
 0x133   : > { %v1743_v9 = vpop.permute.xlu1 %1742 }
 0x137   : > { %v1597_v5 = vpop.permute.xlu1 %1596 }
 0x13b   : > { %v1502_v48 = vpop.permute.xlu1 %1501 }
 0x13c   : > { %v1770_v43 = vsel %vm1767_vm6, %v3380_v39, %v1502_v48 }
 0x13d   : > { %v1779_v61 = vsel %vm1777_vm7, %v1770_v43, %v1521_v32 }
 0x13f   : > { %v1540_v21 = vpop.permute.xlu1 %1539 }
 0x140   : > { %v1786_v30 = vsel %vm1784_vm8, %v1779_v61, %v1540_v21 }
 0x141   : > { %v1793_v23 = vsel %vm1791_vm9, %v1786_v30, %v1559_v20 }
 0x143   : > { %v1724_v8 = vpop.permute.xlu1 %1723  ;;  %v1669_v41 = vpop.permute.xlu0 %1668 }
 0x144   : > { %v1849_v12 = vsel %vm1798_vm10, %v1843_v0, %v1724_v8 }
 0x145   : > { %v1855_v33 = vsel %vm1805_vm11, %v1849_v12, %v1743_v9 }
 0x147   : > { %v1578_v56 = vpop.permute.xlu1 %1577 }
 0x148   : > { %v1800_v54 = vsel %vm1798_vm10, %v1793_v23, %v1578_v56 }
 0x149   : > { %v1807_v40 = vsel %vm1805_vm11, %v1800_v54, %v1597_v5 }
 0x14b   : > { %v1762_v57 = vpop.permute.xlu1 %1761 }
 0x14c   : > { %v1861_v55 = vsel %vm1812_vm12, %v1855_v33, %v1762_v57 }
 0x14d   : > { %1878 = vmatprep.subr.bf16.mxu0 %v1861_v55 }
 0x14f   : > { %v1616_v11 = vpop.permute.xlu1 %1615 }
 0x150   : > { %v1814_v2 = vsel %vm1812_vm12, %v1807_v40, %v1616_v11  ;;  %v1868_v40 = vld [vmem:[%s3356_s1] sm:$0xf] }
 0x151   : > { %1879 = vmatpush1.bf16.msra.mxu0 %v1814_v2 }
 0x15b   : > { %v1523_v58 = vpop.permute.xlu0 %1522 }
 0x15f   : > { %v1707_v15 = vpop.permute.xlu0 %1706 }
 0x163   : > { %v1561_v45 = vpop.permute.xlu0 %1560 }
 0x167   : > { %v1650_v10 = vpop.permute.xlu0 %1649 }
 0x168   : > { %v1826_v17 = vsel %vm1767_vm6, %v3383_v59, %v1650_v10 }
 0x169   : > { %v1833_v29 = vsel %vm1777_vm7, %v1826_v17, %v1669_v41 }
 0x16b   : > { %v1504_v16 = vpop.permute.xlu0 %1503  ;;  %v1506_v37 = vpop.permute.xlu1 %1505 }
 0x16c   : > { %v1773_v46 = vsel %vm1767_vm6, %v2129_v36, %v1504_v16  ;;  %v1776_v43 = vsel %vm1767_vm6, %v2130_v14, %v1506_v37 }
 0x16d   : > { %v1781_v4 = vsel %vm1777_vm7, %v1773_v46, %v1523_v58 }
 0x16f   : > { %v1688_v19 = vpop.permute.xlu0 %1687  ;;  %v1652_v3 = vpop.permute.xlu1 %1651 }
 0x170   : > { %v1839_v47 = vsel %vm1784_vm8, %v1833_v29, %v1688_v19  ;;  %v1829_v34 = vsel %vm1767_vm6, %v2154_v60, %v1652_v3 }
 0x171   : > { %v1845_v32 = vsel %vm1791_vm9, %v1839_v47, %v1707_v15 }
 0x173   : > { %v1542_v63 = vpop.permute.xlu0 %1541  ;;  %v1525_v44 = vpop.permute.xlu1 %1524 }
 0x174   : > { %v1788_v31 = vsel %vm1784_vm8, %v1781_v4, %v1542_v63  ;;  %v1783_v61 = vsel %vm1777_vm7, %v1776_v43, %v1525_v44 }
 0x175   : > { %v1795_v13 = vsel %vm1791_vm9, %v1788_v31, %v1561_v45 }
 0x177   : > { %v1726_v35 = vpop.permute.xlu0 %1725  ;;  %v1671_v28 = vpop.permute.xlu1 %1670 }
 0x178   : > { %v1851_v20 = vsel %vm1798_vm10, %v1845_v32, %v1726_v35  ;;  %v1835_v62 = vsel %vm1777_vm7, %v1829_v34, %v1671_v28 }
 0x17b   : > { %v1580_v27 = vpop.permute.xlu0 %1579  ;;  %v1544_v51 = vpop.permute.xlu1 %1543 }
 0x17c   : > { %v1802_v36 = vsel %vm1798_vm10, %v1795_v13, %v1580_v27  ;;  %v1790_v12 = vsel %vm1784_vm8, %v1783_v61, %v1544_v51 }
 0x17f   : > { %v1745_v25 = vpop.permute.xlu0 %1744  ;;  %v1690_v7 = vpop.permute.xlu1 %1689 }
 0x180   : > { %v1857_v9 = vsel %vm1805_vm11, %v1851_v20, %v1745_v25  ;;  %v1841_v1 = vsel %vm1784_vm8, %v1835_v62, %v1690_v7 }
 0x183   : > { %v1599_v50 = vpop.permute.xlu0 %1598  ;;  %v1563_v6 = vpop.permute.xlu1 %1562 }
 0x184   : > { %v1809_v53 = vsel %vm1805_vm11, %v1802_v36, %v1599_v50  ;;  %v1797_v23 = vsel %vm1791_vm9, %v1790_v12, %v1563_v6 }
 0x187   : > { %v1764_v52 = vpop.permute.xlu0 %1763  ;;  %v1709_v5 = vpop.permute.xlu1 %1708 }
 0x188   : > { %v1864_v18 = vsel %vm1812_vm12, %v1857_v9, %v1764_v52  ;;  %v1847_v39 = vsel %vm1791_vm9, %v1841_v1, %v1709_v5 }
 0x189   : > { %1880 = vmatprep.subr.bf16.mxu0 %v1864_v18 }
 0x18b   : > { %v1618_v48 = vpop.permute.xlu0 %1617  ;;  %v1728_v21 = vpop.permute.xlu1 %1727 }
 0x18c   : > { %v1817_v24 = vsel %vm1812_vm12, %v1809_v53, %v1618_v48  ;;  %v1853_v38 = vsel %vm1798_vm10, %v1847_v39, %v1728_v21 }
 0x18d   : > { %1881 = vmatpush1.bf16.msra.mxu0 %v1817_v24 }
 0x18f   : > { %v1582_v8 = vpop.permute.xlu0 %1581  ;;  %v1747_v42 = vpop.permute.xlu1 %1746 }
 0x190   : > { %v1859_v0 = vsel %vm1805_vm11, %v1853_v38, %v1747_v42  ;;  %v1804_v57 = vsel %vm1798_vm10, %v1797_v23, %v1582_v8 }
 0x193   : > { %v1601_v56 = vpop.permute.xlu0 %1600  ;;  %v1766_v30 = vpop.permute.xlu1 %1765 }
 0x194   : > { %v1867_v49 = vsel %vm1812_vm12, %v1859_v0, %v1766_v30  ;;  %v1811_v33 = vsel %vm1805_vm11, %v1804_v57, %v1601_v56 }
 0x195   : > { %2176 = vmatprep.subr.msk.bf16.mxu0 %vm1873_vm13, %v1867_v49 }
 0x197   : > { %v1620_v54 = vpop.permute.xlu0 %1619 }
 0x198   : > { %v1820_v55 = vsel %vm1812_vm12, %v1811_v33, %v1620_v54 }
 0x199   : > { %v1874_v11 = vsel %vm1873_vm13, %v1820_v55, 0 }
 0x19a   : > { %1883 = vmatpush1.bf16.msra.mxu0 %v1874_v11 }
 0x19d   : > { %2177 = vmatmul.mubr.msk.bf16.vlgmr.msra.gmra.mrb[0].mxu0 %vm1869_vm14, %v1868_v40 }
 0x270   : > { %v1912_v2 = vpop.f32.mrb[0].mxu0 }
 0x271   : > { %v1919_v41 = vpack.c.bf16 %v1912_v2, %v1912_v2  ;;  %v1914_v58 = vpop.f32.mrb[1].mxu0 }
 0x272   : > { %v1920_v15 = vpack.c.bf16 %v1914_v58, %v1914_v58  ;;  %v2208_v45 = vpack.c.bf16 %v1914_v58, %v1912_v2  ;;  %v1916_v10 = vpop.f32.mrb[2].mxu0 }
 0x273   : > { %v1928_v16 = vunpack.c.l.bf16 %v1919_v41  ;;  %v1917_v37 = vpop.f32.mrb[3].mxu0 }
 0x274   : > { %v1929_v19 = vunpack.c.l.bf16 %v1920_v15  ;;  %1927 = vst [vmem:[%s236_s9] sm:$0xff] %v2208_v45 }
 0x276   : > { %v1930_v3 = vadd.f32 %v1929_v19, %v1928_v16 }
 0x278   : > { %1931 = vadd.xlane.f32.xlu0 %v1930_v3 }
 0x305   : > { %v1932_v63 = vpop.xlane.xlu0 %1931 }
 0x306   : > { %v1933_v44 = vmul.f32 0.00390625, %v1932_v63  ;;  %1942 = vst.msk [vmem:[%s267_s13] sm:$0xff] %vm1941_vm15, %v1932_v63 }
 0x308   : > { %v1934_v35 = vsub.f32 %v1928_v16, %v1933_v44  ;;  %v1935_v28 = vsub.f32 %v1929_v19, %v1933_v44 }
 0x30a   : > { %v1936_v27 = vmul.f32 %v1934_v35, %v1934_v35  ;;  %v1937_v51 = vmul.f32 %v1935_v28, %v1935_v28 }
 0x30c   : > { %v1938_v22 = vadd.f32 %v1937_v51, %v1936_v27 }
 0x30e   : > { %1939 = vadd.xlane.f32.xlu1 %v1938_v22 }
 0x30f   : > { %2291 = shalt.err (!%p2288_p5)
}
 0x310   : > { %s2292_s21 = scalar_lea.hbm %s3306_s17, 128  ;;  %s2296_s12 = scalar_lea.hbm %s3358_s3, 256 }
 0x311   : > { %p2293_p6 = scmp.ne.s32.totalorder %s3306_s17, %s2292_s21  ;;  %p2297_p10 = scmp.lt.u32.totalorder %s3306_s17, %s3358_s3 }
 0x312   : > { %p2298_p11 = scmp.lt.u32.totalorder %s2296_s12, %s2292_s21  ;;  %p2300_p13 = scmp.lt.u32.totalorder %s2292_s21, %s3306_s17 }
 0x313   : > { %p2294_p7 = pnand %p2293_p6, %p2441_p4 }
 0x314   : > { %p2299_p12 = por %p2298_p11, %p2297_p10 }
 0x315   : > { %p2295_p9 = pneg %p2294_p7 }
 0x316   : > { %p2301_p0 = por %p2300_p13, %p2299_p12 }
 0x318   : > { %p2302_p1 = pnand %p2301_p0, %p2295_p9 }
 0x31a   : > { %2305 = shalt.err (!%p2302_p1)
}
 0x31b   : > { %2211 = dma.vmem_to_hbm [thread:$0]  (%p2441_p4), %s1976_s23, 128, %s3306_s17, %s1945_s24  }
 0x31c   : > { %s274_s26 = scalar_lea.vmem %s3360_s5, %s2122_s10 }
 0x39b   : > { %v1940_v26 = vpop.xlane.xlu1 %1939 }
 0x39c   : > { %1943 = vst.msk [vmem:[%s274_s26] sm:$0xff] %vm1941_vm15, %v1940_v26 }
 0x39d PF: > { %p2217_p2 = scmp.ge.s32.totalorder %s2356_s22, 2  ;;  %s1993_s28 = sand.u32 1, %s2336_s18  }
 0x39e   : > { %s1994_s27 = scalar_lea.sflag [#allocation3], %s1993_s28 }
 0x39f   : > { %p2214_p3 = pnand %p2217_p2, %p2448_p8 }
 0x3a1   : > { %2331 = dma.done.wait (!%p2214_p3), %s1994_s27, 128  }
 0x3a2   : > { %2333 = vsyncadd (!%p2214_p3), %s1994_s27, 4294967168  ;;  %s19_s22 = sadd.s32 1, %s2356_s22   ;;  %s3384_s18 = smov %s2340_s19 }
 0x3a3   : > { %p16_p4 = scmp.ge.s32.totalorder %s19_s22, 4   ;;  %s3385_s19 = smov %s2344_s20 }
 0x3a4   : > { %s3386_s20 = smov %s2454_s30  ;;  %s3387_s21 = smov %s2352_s2 }
 0x3a5   : > { %s3388_s2 = smov %s3390_s25  ;;  %18 = sbr.rel (!%p16_p4) target bundleno = 4 (0x4), region = 92 }
 0x3ac   :  { %2019 = vsyncpa [#allocation3], 1 }
 0x3ad   :  { %2021 = vsyncpa [#allocation3 + $0x1], 1 }

</bundles_post_ra>
